<compile_context>
chip_gen: v5e
topology: v5e:2x2
jax: 0.10.0
libtpu: 0.0.40
codegen_flags: <defaults>
</compile_context>

<pallas_src>
from collections import namedtuple
from functools import partial

import jax
import jax.numpy as jnp
from jax import lax
from jax.experimental import pallas as pl
from jax.experimental.pallas import tpu as pltpu


# ----------------------------- Pallas kernel --------------------------------
def _cond_model_kernel(x_ref, ctx_ref, bias_ref, w_ref, out_ref, *,
                       cin, cmid, dc, cs, offs):
    """Channel-major conditional model step for one batch element.

    x_ref    : (1, Cin,  N)   already channel-concatenated [sample; concat]
    ctx_ref  : (1, S,   Dc)   crossattn tokens (row layout; tiny)
    bias_ref : (1, Cmid, 1)   b_in + class_labels @ w_cls (per batch)
    w_ref    : (R, Ctot)      packed, lane-aligned weight slab
    out_ref  : (1, Cs,   N)
    """
    f32 = jnp.float32
    x = x_ref[0].astype(f32)            # (Cin, N)
    ctx = ctx_ref[0].astype(f32)        # (S, Dc)
    bias = bias_ref[0].astype(f32)      # (Cmid, 1)

    # static slices into the packed weight slab (128-aligned column offsets)
    w_in_t = w_ref[0:cmid, offs["in"]:offs["in"] + cin]         # (Cmid, Cin)
    wq_t = w_ref[0:cmid, offs["q"]:offs["q"] + cmid]            # (Cmid, Cmid) scaled
    wkv = w_ref[0:dc, offs["kv"]:offs["kv"] + 2 * cmid]         # (Dc, 2*Cmid)
    wo_t = w_ref[0:cmid, offs["o"]:offs["o"] + cmid]            # (Cmid, Cmid)
    w_out_t = w_ref[0:cs, offs["out"]:offs["out"] + cmid]       # (Cs, Cmid)
    b_out = w_ref[0:cs, offs["b"]:offs["b"] + 1]                # (Cs, 1)

    # fused channel-concat + 1x1 in-projection + (b_in + class embedding)
    h = jnp.dot(w_in_t, x, preferred_element_type=f32) + bias   # (Cmid, N)

    # single-head cross-attention, channel-major (lane dim = N everywhere)
    q = jnp.dot(wq_t, h, preferred_element_type=f32)            # (Cmid, N)
    kv = jnp.dot(ctx, wkv, preferred_element_type=f32)          # (S, 2*Cmid)
    k = kv[:, :cmid]                                            # (S, Cmid)
    v = kv[:, cmid:]                                            # (S, Cmid)

    scores = lax.dot_general(k, q, (((1,), (0,)), ((), ())),
                             preferred_element_type=f32)        # (S, N)
    scores = scores - jnp.max(scores, axis=0, keepdims=True)
    p = jnp.exp(scores)                                         # (S, N)
    l = jnp.sum(p, axis=0, keepdims=True)                       # (1, N)
    attn = lax.dot_general(v, p, (((0,), (0,)), ((), ())),
                           preferred_element_type=f32)          # (Cmid, N)
    attn = attn * pl.reciprocal(l, approx=True)                 # normalize once
    h = h + jnp.dot(wo_t, attn, preferred_element_type=f32)     # (Cmid, N)

    out = jnp.dot(w_out_t, h, preferred_element_type=f32) + b_out
    out_ref[0] = out.astype(out_ref.dtype)                      # (Cs, N) lane-dense


# --------------------------- host-side weight packing ------------------------
def pack_params(params):
    """One-time host-side packing: fuse/transpose weights into channel-major
    form, fold the 1/sqrt(Cmid) softmax scale into wq, fuse wk/wv, and pack
    everything into a single lane-aligned f32 slab."""
    w_in = jnp.concatenate([params["w_in_s"], params["w_in_c"]], axis=0)  # (Cin, Cmid)
    cin, cmid = w_in.shape
    dc = params["wk"].shape[0]
    cs = params["w_out"].shape[1]
    scale = 1.0 / (float(cmid) ** 0.5)

    regions = {
        "in":  jnp.transpose(w_in),                                   # (Cmid, Cin)
        "q":   jnp.transpose(params["wq"]) * scale,                   # (Cmid, Cmid)
        "kv":  jnp.concatenate([params["wk"], params["wv"]], axis=1), # (Dc, 2*Cmid)
        "o":   jnp.transpose(params["wo"]),                           # (Cmid, Cmid)
        "out": jnp.transpose(params["w_out"]),                        # (Cs, Cmid)
        "b":   jnp.transpose(params["b_out"]),                        # (Cs, 1)
    }
    rows = -(-max(cmid, dc, cs) // 8) * 8
    blocks, offsets, col = [], {}, 0
    for name, w in regions.items():
        r, c = w.shape
        cols = -(-c // 128) * 128                 # lane-align each region
        blocks.append(jnp.pad(w.astype(jnp.float32),
                              ((0, rows - r), (0, cols - c))))
        offsets[name] = col
        col += cols
    slab = jnp.concatenate(blocks, axis=1)        # (rows, col), col % 128 == 0

    return dict(slab=slab, offsets=offsets, cin=cin, cmid=cmid, dc=dc, cs=cs,
                w_cls=params["w_cls"], b_in=params["b_in"])


# ------------------------------ model wrapper -------------------------------
ModelOutput = namedtuple("ModelOutput", ["sample"])


def synthetic_model_apply(packed, x_nchw, *args, encoder_hidden_states=None,
                          class_labels=None, **kwargs):
    """Synthetic conditional model; *args/**kwargs (e.g. timestep) ignored."""
    B, C, H, W = x_nchw.shape
    cin, cmid, dc, cs = packed["cin"], packed["cmid"], packed["dc"], packed["cs"]
    assert C == cin
    N = H * W
    S = encoder_hidden_states.shape[1]
    slab = packed["slab"]
    rows, slab_cols = slab.shape

    # channel-major tokens: NCHW -> (B, C, H*W) is a pure reshape (no transpose)
    x_cm = x_nchw.reshape(B, C, N)

    # fold b_in + class-label embedding into one per-batch bias (tiny XLA op)
    bias = packed["b_in"] + class_labels.astype(jnp.float32) @ packed["w_cls"]
    bias = bias.reshape(B, cmid, 1)

    kernel = partial(_cond_model_kernel, cin=cin, cmid=cmid, dc=dc, cs=cs,
                     offs=packed["offsets"])

    out_cm = pl.pallas_call(
        kernel,
        out_shape=jax.ShapeDtypeStruct((B, cs, N), x_nchw.dtype),
        grid=(B,),
        in_specs=[
            pl.BlockSpec((1, cin, N), lambda b: (b, 0, 0)),        # x (channel-major)
            pl.BlockSpec((1, S, dc), lambda b: (b, 0, 0)),         # crossattn
            pl.BlockSpec((1, cmid, 1), lambda b: (b, 0, 0)),       # fused bias
            pl.BlockSpec((rows, slab_cols), lambda b: (0, 0)),     # weight slab
        ],
        out_specs=pl.BlockSpec((1, cs, N), lambda b: (b, 0, 0)),
        compiler_params=pltpu.CompilerParams(
            dimension_semantics=("parallel",)),
    )(x_cm, encoder_hidden_states, bias, slab)

    # channel-major (B, Cs, H*W) -> NCHW is again just a reshape
    return ModelOutput(sample=out_cm.reshape(B, cs, H, W))


def cond_wrapper_forward(packed, sample, *args, conditioning=None, **kwargs):
    """Exact CondWrapper_.forward semantics."""
    class_labels = conditioning.get("vector", None)
    crossattn = conditioning.get("crossattn", None)
    concat = conditioning.get("concat", None)
    if concat is not None:
        sample = jnp.concatenate([sample, concat], axis=1)   # dim=1 (NCHW)
    # TODO(synk): synthetic model's in-projection is sized for Cs+Cc channels;
    #             a concat=None call would need a model built for Cs inputs.
    return synthetic_model_apply(
        packed, sample, *args,
        encoder_hidden_states=crossattn, class_labels=class_labels,
        **kwargs).sample


# --------------------------- pure-JAX reference ------------------------------
def _nchw_to_tokens(x):
    B, C, H, W = x.shape
    return jnp.transpose(x, (0, 2, 3, 1)).reshape(B, H * W, C)


def _tokens_to_nchw(x, H, W):
    B, N, C = x.shape
    return jnp.transpose(x.reshape(B, H, W, C), (0, 3, 1, 2))


def reference_forward(params, sample, conditioning):
    class_labels = conditioning["vector"]
    crossattn = conditioning["crossattn"]
    concat = conditioning["concat"]
    x = jnp.concatenate([sample, concat], axis=1)
    B, C, H, W = x.shape
    tok = _nchw_to_tokens(x).astype(jnp.float32)             # (B, N, Cs+Cc)
    w_in = jnp.concatenate([params["w_in_s"], params["w_in_c"]], axis=0)
    h = jnp.einsum("bnc,cm->bnm", tok, w_in) + params["b_in"]
    h = h + (class_labels.astype(jnp.float32) @ params["w_cls"])[:, None, :]
    ctx = crossattn.astype(jnp.float32)
    q = jnp.einsum("bnm,mh->bnh", h, params["wq"])
    k = jnp.einsum("bsd,dh->bsh", ctx, params["wk"])
    v = jnp.einsum("bsd,dh->bsh", ctx, params["wv"])
    scores = jnp.einsum("bnh,bsh->bns", q, k) / jnp.sqrt(jnp.float32(q.shape[-1]))
    p = jax.nn.softmax(scores, axis=-1)
    attn = jnp.einsum("bns,bsh->bnh", p, v)
    h = h + jnp.einsum("bnh,hm->bnm", attn, params["wo"])
    out = jnp.einsum("bnm,mc->bnc", h, params["w_out"]) + params["b_out"]
    return _tokens_to_nchw(out.astype(sample.dtype), H, W)


# ---------------------------------- main -------------------------------------
if __name__ == "__main__":
    B, Cs, Cc, H, W = 2, 4, 4, 16, 16
    S, Dc, Dv, Cmid = 8, 32, 32, 32

    key = jax.random.PRNGKey(0)
    keys = jax.random.split(key, 16)

    params = {
        "w_in_s": jax.random.normal(keys[0], (Cs, Cmid), jnp.float32) * 0.1,
        "w_in_c": jax.random.normal(keys[1], (Cc, Cmid), jnp.float32) * 0.1,
        "b_in":   jax.random.normal(keys[2], (1, Cmid), jnp.float32) * 0.1,
        "w_cls":  jax.random.normal(keys[3], (Dv, Cmid), jnp.float32) * 0.1,
        "wq":     jax.random.normal(keys[4], (Cmid, Cmid), jnp.float32) * 0.1,
        "wk":     jax.random.normal(keys[5], (Dc, Cmid), jnp.float32) * 0.1,
        "wv":     jax.random.normal(keys[6], (Dc, Cmid), jnp.float32) * 0.1,
        "wo":     jax.random.normal(keys[7], (Cmid, Cmid), jnp.float32) * 0.1,
        "w_out":  jax.random.normal(keys[8], (Cmid, Cs), jnp.float32) * 0.1,
        "b_out":  jax.random.normal(keys[9], (1, Cs), jnp.float32) * 0.1,
    }

    sample = jax.random.normal(keys[10], (B, Cs, H, W), jnp.float32)
    conditioning = {
        "vector":    jax.random.normal(keys[11], (B, Dv), jnp.float32),
        "crossattn": jax.random.normal(keys[12], (B, S, Dc), jnp.float32),
        "concat":    jax.random.normal(keys[13], (B, Cc, H, W), jnp.float32),
    }

    packed = pack_params(params)        # one-time host-side weight packing
    out = cond_wrapper_forward(packed, sample, conditioning=conditioning)
    out = jax.block_until_ready(out)

    ref = reference_forward(params, sample, conditioning)
    assert out.shape == (B, Cs, H, W)
    # tolerance slightly relaxed vs 1e-4 because of pl.reciprocal(approx=True)
    assert jnp.allclose(out, ref, atol=2e-3, rtol=2e-3), "mismatch vs reference"

    print("KERNEL_OK")
</pallas_src>

<mosaic_0001>
module attributes {stable_mosaic.version = 11 : i64} {
  func.func @_cond_model_kernel(%arg0: i32, %arg1: memref<1x8x256xf32, #tpu.memory_space<vmem>>, %arg2: memref<1x8x32xf32, #tpu.memory_space<vmem>>, %arg3: memref<1x32x1xf32, #tpu.memory_space<vmem>>, %arg4: memref<32x768xf32, #tpu.memory_space<vmem>>, %arg5: memref<1x4x256xf32, #tpu.memory_space<vmem>>) attributes {dimension_semantics = [#tpu.dimension_semantics<parallel>], iteration_bounds = array<i64: 2>, scalar_prefetch = 0 : i64, scratch_operands = 0 : i64, tpu.core_type = #tpu.core_type<tc>, window_params = [{transform_indices = @transform_0, window_bounds = array<i64: 1, 8, 256>}, {transform_indices = @transform_1, window_bounds = array<i64: 1, 8, 32>}, {transform_indices = @transform_2, window_bounds = array<i64: 1, 32, 1>}, {pipeline_mode = #tpu.pipeline_mode<synchronous>, transform_indices = @transform_3, window_bounds = array<i64: 32, 768>}, {transform_indices = @transform_4, window_bounds = array<i64: 1, 4, 256>}]} {
    %c0 = arith.constant 0 : index
    %c0_0 = arith.constant 0 : index
    %c0_1 = arith.constant 0 : index
    %0 = vector.load %arg1[%c0, %c0_0, %c0_1] : memref<1x8x256xf32, #tpu.memory_space<vmem>>, vector<1x8x256xf32>
    %1 = vector.shape_cast %0 : vector<1x8x256xf32> to vector<8x256xf32>
    %c0_2 = arith.constant 0 : index
    %c0_3 = arith.constant 0 : index
    %c0_4 = arith.constant 0 : index
    %2 = vector.load %arg2[%c0_2, %c0_3, %c0_4] : memref<1x8x32xf32, #tpu.memory_space<vmem>>, vector<1x8x32xf32>
    %3 = vector.shape_cast %2 : vector<1x8x32xf32> to vector<8x32xf32>
    %c0_5 = arith.constant 0 : index
    %c0_6 = arith.constant 0 : index
    %c0_7 = arith.constant 0 : index
    %4 = vector.load %arg3[%c0_5, %c0_6, %c0_7] : memref<1x32x1xf32, #tpu.memory_space<vmem>>, vector<1x32x1xf32>
    %5 = vector.shape_cast %4 : vector<1x32x1xf32> to vector<32x1xf32>
    %c0_8 = arith.constant 0 : index
    %c0_9 = arith.constant 0 : index
    %6 = vector.load %arg4[%c0_8, %c0_9] : memref<32x768xf32, #tpu.memory_space<vmem>>, vector<32x8xf32>
    %c0_10 = arith.constant 0 : index
    %c128 = arith.constant 128 : index
    %7 = vector.load %arg4[%c0_10, %c128] : memref<32x768xf32, #tpu.memory_space<vmem>>, vector<32x32xf32>
    %c0_11 = arith.constant 0 : index
    %c256 = arith.constant 256 : index
    %8 = vector.load %arg4[%c0_11, %c256] : memref<32x768xf32, #tpu.memory_space<vmem>>, vector<32x64xf32>
    %c0_12 = arith.constant 0 : index
    %c384 = arith.constant 384 : index
    %9 = vector.load %arg4[%c0_12, %c384] : memref<32x768xf32, #tpu.memory_space<vmem>>, vector<32x32xf32>
    %c0_13 = arith.constant 0 : index
    %c512 = arith.constant 512 : index
    %10 = vector.load %arg4[%c0_13, %c512] : memref<32x768xf32, #tpu.memory_space<vmem>>, vector<4x32xf32>
    %c0_14 = arith.constant 0 : index
    %c640 = arith.constant 640 : index
    %11 = vector.load %arg4[%c0_14, %c640] : memref<32x768xf32, #tpu.memory_space<vmem>>, vector<4x1xf32>
    %cst = arith.constant dense<0.000000e+00> : vector<32x256xf32>
    %12 = tpu.matmul %6, %1, %cst {dimension_numbers = #tpu.dot_dimension_numbers<[1], [0], [0], [1], [0, 0, 1, 1], [], []>} : vector<32x8xf32>, vector<8x256xf32>, vector<32x256xf32> -> vector<32x256xf32>
    %13 = vector.broadcast %5 : vector<32x1xf32> to vector<32x256xf32>
    %14 = arith.addf %12, %13 : vector<32x256xf32>
    %cst_15 = arith.constant dense<0.000000e+00> : vector<32x256xf32>
    %15 = tpu.matmul %7, %14, %cst_15 {dimension_numbers = #tpu.dot_dimension_numbers<[1], [0], [0], [1], [0, 0, 1, 1], [], []>} : vector<32x32xf32>, vector<32x256xf32>, vector<32x256xf32> -> vector<32x256xf32>
    %cst_16 = arith.constant dense<0.000000e+00> : vector<8x64xf32>
    %16 = tpu.matmul %3, %8, %cst_16 {dimension_numbers = #tpu.dot_dimension_numbers<[1], [0], [0], [1], [0, 0, 1, 1], [], []>} : vector<8x32xf32>, vector<32x64xf32>, vector<8x64xf32> -> vector<8x64xf32>
    %17 = vector.extract_strided_slice %16 {offsets = [0, 0], sizes = [8, 32], strides = [1, 1]} : vector<8x64xf32> to vector<8x32xf32>
    %18 = vector.extract_strided_slice %16 {offsets = [0, 32], sizes = [8, 32], strides = [1, 1]} : vector<8x64xf32> to vector<8x32xf32>
    %cst_17 = arith.constant dense<0.000000e+00> : vector<8x256xf32>
    %19 = tpu.matmul %17, %15, %cst_17 {dimension_numbers = #tpu.dot_dimension_numbers<[1], [0], [0], [1], [0, 0, 1, 1], [], []>} : vector<8x32xf32>, vector<32x256xf32>, vector<8x256xf32> -> vector<8x256xf32>
    %cst_18 = arith.constant dense<0xFF800000> : vector<256xf32>
    %20 = vector.multi_reduction <maximumf>, %19, %cst_18 [0] : vector<8x256xf32> to vector<256xf32>
    %21 = vector.shape_cast %20 : vector<256xf32> to vector<1x256xf32>
    %22 = vector.broadcast %21 : vector<1x256xf32> to vector<8x256xf32>
    %23 = arith.subf %19, %22 : vector<8x256xf32>
    %24 = math.exp %23 : vector<8x256xf32>
    %cst_19 = arith.constant dense<0.000000e+00> : vector<256xf32>
    %25 = vector.multi_reduction <add>, %24, %cst_19 [0] : vector<8x256xf32> to vector<256xf32>
    %26 = vector.shape_cast %25 : vector<256xf32> to vector<1x256xf32>
    %cst_20 = arith.constant dense<0.000000e+00> : vector<32x256xf32>
    %27 = tpu.matmul %18, %24, %cst_20 {dimension_numbers = #tpu.dot_dimension_numbers<[0], [0], [1], [1], [0, 1, 1, 1], [], []>} : vector<8x32xf32>, vector<8x256xf32>, vector<32x256xf32> -> vector<32x256xf32>
    %28 = tpu.reciprocal %26 {approx = true} : vector<1x256xf32> -> vector<1x256xf32>
    %29 = vector.broadcast %28 : vector<1x256xf32> to vector<32x256xf32>
    %30 = arith.mulf %27, %29 : vector<32x256xf32>
    %cst_21 = arith.constant dense<0.000000e+00> : vector<32x256xf32>
    %31 = tpu.matmul %9, %30, %cst_21 {dimension_numbers = #tpu.dot_dimension_numbers<[1], [0], [0], [1], [0, 0, 1, 1], [], []>} : vector<32x32xf32>, vector<32x256xf32>, vector<32x256xf32> -> vector<32x256xf32>
    %32 = arith.addf %14, %31 : vector<32x256xf32>
    %cst_22 = arith.constant dense<0.000000e+00> : vector<4x256xf32>
    %33 = tpu.matmul %10, %32, %cst_22 {dimension_numbers = #tpu.dot_dimension_numbers<[1], [0], [0], [1], [0, 0, 1, 1], [], []>} : vector<4x32xf32>, vector<32x256xf32>, vector<4x256xf32> -> vector<4x256xf32>
    %34 = vector.broadcast %11 : vector<4x1xf32> to vector<4x256xf32>
    %35 = arith.addf %33, %34 : vector<4x256xf32>
    %c0_23 = arith.constant 0 : index
    %c0_24 = arith.constant 0 : index
    %c0_25 = arith.constant 0 : index
    %36 = vector.load %arg5[%c0_23, %c0_24, %c0_25] : memref<1x4x256xf32, #tpu.memory_space<vmem>>, vector<1x4x256xf32>
    %37 = vector.shape_cast %36 : vector<1x4x256xf32> to vector<4x256xf32>
    %38 = vector.shape_cast %35 : vector<4x256xf32> to vector<1x4x256xf32>
    tpu.vector_store %arg5[%c0_23, %c0_24, %c0_25], %38 {strides = array<i32>} : memref<1x4x256xf32, #tpu.memory_space<vmem>>, vector<1x4x256xf32>,
    return
  }
  func.func @transform_0(%arg0: i32) -> (i32, i32, i32) {
    %c0_i32 = arith.constant 0 : i32
    %c0_i32_0 = arith.constant 0 : i32
    %c0_i32_1 = arith.constant 0 : i32
    return %arg0, %c0_i32, %c0_i32_0 : i32, i32, i32
  }
  func.func @transform_1(%arg0: i32) -> (i32, i32, i32) {
    %c0_i32 = arith.constant 0 : i32
    %c0_i32_0 = arith.constant 0 : i32
    %c0_i32_1 = arith.constant 0 : i32
    return %arg0, %c0_i32, %c0_i32_0 : i32, i32, i32
  }
  func.func @transform_2(%arg0: i32) -> (i32, i32, i32) {
    %c0_i32 = arith.constant 0 : i32
    %c0_i32_0 = arith.constant 0 : i32
    %c0_i32_1 = arith.constant 0 : i32
    return %arg0, %c0_i32, %c0_i32_0 : i32, i32, i32
  }
  func.func @transform_3(%arg0: i32) -> (i32, i32) {
    %c0_i32 = arith.constant 0 : i32
    %c0_i32_0 = arith.constant 0 : i32
    %c0_i32_1 = arith.constant 0 : i32
    return %c0_i32, %c0_i32_0 : i32, i32
  }
  func.func @transform_4(%arg0: i32) -> (i32, i32, i32) {
    %c0_i32 = arith.constant 0 : i32
    %c0_i32_0 = arith.constant 0 : i32
    %c0_i32_1 = arith.constant 0 : i32
    return %arg0, %c0_i32, %c0_i32_0 : i32, i32, i32
  }
}

</mosaic_0001>

<bundles_post_ra>
// kernel: tpu_custom_call.1
= control target key start
LH: loop header
LB: loop body
LE: loop exit
PB: predicated region body
PF: predicated region fallthrough
CT: control target
= control target key end

     0   :  { %9 = vsyncpa [#allocation3], 0  ;;  %s1318_s0 = inlined_call_operand.vmem [shape: f32[2,8,256], index: 0, kind: input, shape index: {}]   ;;  %s1319_s1 = inlined_call_operand.vmem [shape: f32[2,8,32], index: 1, kind: input, shape index: {}]   ;;  %s1320_s2 = inlined_call_operand.vmem [shape: f32[2,32,1], index: 2, kind: input, shape index: {}]   ;;  %s1321_s3 = inlined_call_operand.hbm [shape: f32[32,768], index: 3, kind: input, shape index: {}]   ;;  %s1322_s4 = inlined_call_operand.hbm [shape: f32[2,4,256], index: 4, kind: output, shape index: {}]  }
   0x1   :  { %10 = vsyncpa [#allocation4], 0 }
   0x2   :  { %12 = vsyncpa [#allocation4 + $0x1], 0  ;;  %s1143_s15 = smov 0   ;;  %s1145_s16 = smov 0  }
   0x3   :  { %s1147_s17 = smov 0   ;;  %s1149_s18 = smov 0  }
   0x4 LB: > { %s1164_s19 = sadd.s32 4294967295, %s1111_s18   ;;  %s893_s20 = sadd.s32 4294967294, %s1111_s18   ;;  %s1111_s18 = sphi %s1149_s18, %s1328_s18   ;;  %s1107_s17 = sphi %s1147_s17, %s1327_s17   ;;  %s1103_s16 = sphi %s1145_s16, %s1326_s16   ;;  %s1099_s15 = sphi %s1143_s15, %s1325_s15  }
   0x5   : > { %s1168_s21 = sadd.s32 1, %s1111_s18   ;;  %s124_s22 = sadd.s32 1, %s1107_s17 }
   0x6   : > { %s121_s23 = ssub.s32 %s1111_s18, %s1168_s21  ;;  %p134_p0 = scmp.ne.s32.totalorder %s1107_s17, %s1103_s16 }
   0x7   : > { %p122_p1 = scmp.eq.s32.totalorder %s121_s23, 0  ;;  %p135_p2 = scmp.eq.s32.totalorder %s1164_s19, 1 }
   0x8   : > { %p140_p3 = scmp.ne.s32.totalorder %s1103_s16, %s1099_s15  ;;  %p141_p4 = scmp.eq.s32.totalorder %s893_s20, 1 }
   0x9   : > { %s1179_s24 = scalar_select %p122_p1, %s1107_s17, %s124_s22  }
   0xa   : > { %p1181_p5 = por %p135_p2, %p134_p0  ;;  %p1185_p6 = por %p141_p4, %p140_p3 }
   0xb   : > { %p894_p7 = scmp.ge.s32.totalorder %s1111_s18, 1  ;;  %p148_p8 = scmp.lt.s32.totalorder %s1111_s18, 3 }
   0xc   : > { %p964_p9 = scmp.eq.s32.totalorder %s1164_s19, 0  ;;  %s159_s29 = sshll.u32 %s1321_s3, 4  ;;  %s160_s29 = int_to_ptr.hbm [resolvable:$true] %s159_s29 }
   0xd   : > { %p149_p10 = pnand %p894_p7, %p148_p8  ;;  %s1113_s30 = smov [#allocation2]  }
   0xe   : > { %s161_s5 = sshll.u32 %s1113_s30, 4  ;;  %s1114_s6 = smov 768   ;;  %s162_s5 = int_to_ptr.vmem [resolvable:$true] %s161_s5 }
   0xf   : > { %p956_p11 = pneg %p149_p10  ;;  %s1115_s7 = smov 48  }
  0x10   : > { %200 = sbr.rel (%p149_p10) target bundleno = 966 (0x3c6), region = 36 }
  0x11   : > { %p957_p12 = pnand %p964_p9, %p956_p11 }
  0x13   : > { %959 = dma.hbm_to_vmem [thread:$0]  (!%p957_p12), %s160_s29, 3072, %s162_s5, [#allocation3], %s1114_s6, %s1114_s6, %s1115_s7  }
  0x15   : > { %1090 = dma.done.wait (%p964_p9), [#allocation3], 3072  }
  0x16   : > { %1092 = vsyncadd (%p964_p9), [#allocation3], 4294964224  ;;  %p236_p13 = scmp.lt.s32.totalorder %s1164_s19, 1  ;;  %v1116_v0 = vmov 0   ;;  %vm295_vm0 = vcmask 64512   ;;  %v257_v3 = vld [vmem:[#allocation2] sm:$0xff] }
  0x17   : > { %1006 = vset.pattern.permute.xlu1 %v1116_v0  ;;  %1005 = vset.pattern.permute.xlu0 %v1116_v0  ;;  %v268_v6 = vld [vmem:[#allocation2 + $0xa0] sm:$0xff]  ;;  %v267_v7 = vld [vmem:[#allocation2 + $0x70] sm:$0xff]  ;;  %v274_v14 = vld [vmem:[#allocation2 + $0x28] sm:$0xf]  ;;  %vm366_vm1 = vcmask 261120   ;;  %s1117_s30 = smov 96  }
  0x18   : > { %s1203_s8 = scalar_select %p236_p13, %s1164_s19, 1  ;;  %v266_v8 = vld [vmem:[#allocation2 + $0x40] sm:$0xff]  ;;  %v258_v9 = vld [vmem:[#allocation2 + $0x30] sm:$0xff]  ;;  %v261_v37 = vld [vmem:[#allocation2 + $0x8] sm:$0xff]  ;;  %vm777_vm2 = vcmask 1043456  }
  0x19   : > { %v265_v12 = vld [vmem:[#allocation2 + $0x10] sm:$0xff]  ;;  %v259_v13 = vld [vmem:[#allocation2 + $0x60] sm:$0xff]  ;;  %v262_v39 = vld [vmem:[#allocation2 + $0x38] sm:$0xff]  ;;  %s233_s5 = sand.u32 1, %s1103_s16   ;;  %s949_s7 = sshll.u32 %s1164_s19, 3 }
  0x1a   : > { %s947_s9 = sshll.u32 %s1203_s8, 4  ;;  %s948_s10 = sshll.u32 %s1203_s8, 5  ;;  %v260_v15 = vld [vmem:[#allocation2 + $0x90] sm:$0xff]  ;;  %v263_v40 = vld [vmem:[#allocation2 + $0x68] sm:$0xff]  ;;  %v264_v41 = vld [vmem:[#allocation2 + $0x98] sm:$0xff] }
  0x1b   : > { %s240_s13 = scalar_lea.vmem %s1318_s0, %s947_s9  ;;  %s249_s22 = scalar_lea.vmem %s1320_s2, %s948_s10 }
  0x1c   : > { %v250_v1 = vld [vmem:[%s240_s13] sm:$0xff]  ;;  %v251_v2 = vld [vmem:[%s240_s13 + $0x8] sm:$0xff]  ;;  %v256_v5 = vld [vmem:[%s249_s22 + $0x18] sm:$0xff]  ;;  %s902_s23 = sshll.u32 %s1203_s8, 3  ;;  %s899_s6 = sshll.u32 %s233_s5, 3 }
  0x1d   : > { %323 = vmatpush.msra.mxu0 %v250_v1  ;;  %352 = vmatpush.msra.mxu1 %v251_v2  ;;  %v254_v4 = vld [vmem:[%s249_s22 + $0x8] sm:$0xff]  ;;  %v253_v10 = vld [vmem:[%s249_s22] sm:$0xff]  ;;  %v255_v11 = vld [vmem:[%s249_s22 + $0x10] sm:$0xff]  ;;  %s244_s29 = scalar_lea.vmem %s1319_s1, %s902_s23  ;;  %s793_s10 = scalar_lea.hbm %s1322_s4, %s949_s7 }
  0x1e   : > { %905 = vmatmul.msk.f32.vlgmr.msra.gmra.mxu0 %vm295_vm0, %v257_v3  ;;  %909 = vmatmul.msk.f32.vlgmr.msra.gmra.mxu1 %vm295_vm0, %v257_v3  ;;  %v252_v16 = vld [vmem:[%s244_s29] sm:$0xff]  ;;  %s235_s11 = scalar_lea.vmem [#allocation5], %s899_s6  ;;  %s797_s13 = sshll.u32 %s793_s10, 4  ;;  %s798_s13 = int_to_ptr.hbm [resolvable:$true] %s797_s13 }
  0x1f   : > { %282 = vperm.xlu1 %1006, %v254_v4   ;;  %292 = vperm.xlu0 %1005, %v256_v5   ;;  %s795_s12 = sshll.u32 %s235_s11, 4  ;;  %s782_s19 = scalar_lea.sflag [#allocation4], %s233_s5  ;;  %s796_s12 = int_to_ptr.vmem [resolvable:$true] %s795_s12 }
  0x20   : > { %452 = vmatpush.msrb.mxu0 %v268_v6  ;;  %s1059_s14 = sshra.s32 %s798_s13, 4  ;;  %s1065_s27 = scalar_lea.hbm %s1322_s4, 16  ;;  %s1060_s14 = int_to_ptr.hbm [resolvable:$true] %s1059_s14 }
  0x21   : > { %s1061_s20 = scalar_lea.hbm %s1060_s14, 8  ;;  %p1066_p3 = scmp.lt.s32.totalorder %s1060_s14, %s1322_s4 }
  0x22   : > { %453 = vmatpush.msrb.mxu0 %v267_v7  ;;  %p1062_p0 = scmp.ne.s32.totalorder %s1060_s14, %s1061_s20  ;;  %p1067_p4 = scmp.lt.s32.totalorder %s1065_s27, %s1061_s20 }
  0x24   : > { %454 = vmatpush.msrb.mxu0 %v266_v8  ;;  %p1063_p1 = pnand %p1062_p0, %p1181_p5  ;;  %p1068_p7 = por %p1067_p4, %p1066_p3 }
  0x26   : > { %906 = vmatmul.msk.f32.gmra.mxu0 %vm295_vm0, %v258_v9  ;;  %910 = vmatmul.msk.f32.gmra.mxu1 %vm295_vm0, %v258_v9  ;;  %p1064_p2 = pneg %p1063_p1 }
  0x27   : > { %277 = vperm.xlu1 %1006, %v253_v10   ;;  %287 = vperm.xlu0 %1005, %v255_v11  }
  0x28   : > { %455 = vmatpush.msrb.mxu0 %v265_v12  ;;  %p1069_p8 = pnand %p1068_p7, %p1064_p2 }
  0x2e   : > { %907 = vmatmul.msk.f32.gmra.mxu0 %vm295_vm0, %v259_v13  ;;  %911 = vmatmul.msk.f32.gmra.mxu1 %vm295_vm0, %v259_v13 }
  0x2f   : > { %728 = vperm.xlu0 %1005, %v274_v14  }
  0x36   : > { %908 = vmatmul.msk.f32.gmra.mxu0 %vm295_vm0, %v260_v15  ;;  %912 = vmatmul.msk.f32.gmra.mxu1 %vm295_vm0, %v260_v15 }
  0x3e   : > { %921 = vmatmul.msk.f32.vlgmr.msrb.gmra.mxu0 %vm366_vm1, %v252_v16 }
  0x91   : > { %v293_v21 = vpop.permute.xlu0 %292  ;;  %v283_v24 = vpop.permute.xlu1 %282 }
  0x99   : > { %v288_v29 = vpop.permute.xlu0 %287  ;;  %v278_v32 = vpop.permute.xlu1 %277 }
  0x9b   : > { %v325_v17 = vpop.f32.mrf.mxu0  ;;  %v354_v18 = vpop.f32.mrf.mxu1 }
  0x9c   : > { %v1242_v35 = vadd.f32 %v325_v17, %v278_v32  ;;  %v1244_v36 = vadd.f32 %v354_v18, %v278_v32 }
  0xa3   : > { %v328_v19 = vpop.f32.mrf.mxu0  ;;  %v357_v20 = vpop.f32.mrf.mxu1 }
  0xa4   : > { %v1236_v33 = vadd.f32 %v328_v19, %v283_v24  ;;  %v1238_v34 = vadd.f32 %v357_v20, %v283_v24 }
  0xab   : > { %v331_v22 = vpop.f32.mrf.mxu0  ;;  %v360_v23 = vpop.f32.mrf.mxu1 }
  0xac   : > { %v1230_v30 = vadd.f32 %v331_v22, %v288_v29  ;;  %v1232_v31 = vadd.f32 %v360_v23, %v288_v29 }
  0xb3   : > { %v334_v25 = vpop.f32.mrf.mxu0  ;;  %v363_v26 = vpop.f32.mrf.mxu1 }
  0xb4   : > { %v1226_v27 = vadd.f32 %v334_v25, %v293_v21  ;;  %v1228_v28 = vadd.f32 %v363_v26, %v293_v21 }
  0xb6   : > { %391 = vmatpush.msra.mxu2 %v1226_v27  ;;  %420 = vmatpush.msra.mxu3 %v1228_v28 }
  0xb8   : > { %392 = vmatpush.msra.mxu2 %v1230_v30  ;;  %421 = vmatpush.msra.mxu3 %v1232_v31 }
  0xba   : > { %393 = vmatpush.msra.mxu2 %v1236_v33  ;;  %422 = vmatpush.msra.mxu3 %v1238_v34 }
  0xbb   : > { %v457_v38 = vpop.f32.mrf.mxu0 }
  0xbc   : > { %394 = vmatpush.msra.mxu2 %v1242_v35  ;;  %423 = vmatpush.msra.mxu3 %v1244_v36 }
  0xbd   : > { %913 = vmatmul.msk.f32.vlgmr.msra.gmra.mxu2 %vm366_vm1, %v261_v37  ;;  %917 = vmatmul.msk.f32.vlgmr.msra.gmra.mxu3 %vm366_vm1, %v261_v37 }
  0xbe   : > { %533 = vrot.lane.b32.xlu2 %v457_v38, %s1117_s30 }
  0xc5   : > { %914 = vmatmul.msk.f32.gmra.mxu2 %vm366_vm1, %v262_v39  ;;  %918 = vmatmul.msk.f32.gmra.mxu3 %vm366_vm1, %v262_v39 }
  0xcd   : > { %915 = vmatmul.msk.f32.gmra.mxu2 %vm366_vm1, %v263_v40  ;;  %919 = vmatmul.msk.f32.gmra.mxu3 %vm366_vm1, %v263_v40 }
  0xd5   : > { %916 = vmatmul.msk.f32.gmra.mxu2 %vm366_vm1, %v264_v41  ;;  %920 = vmatmul.msk.f32.gmra.mxu3 %vm366_vm1, %v264_v41 }
 0x118   : > { %v534_v42 = vpop.permute.xlu2 %533 }
 0x119   : > { %536 = vxpose.xlu2.b32.start.end [1/1] (short) (narrow) %v534_v42, 32 }
 0x140   : > { %v396_v43 = vpop.f32.mrf.mxu2  ;;  %v425_v44 = vpop.f32.mrf.mxu3 }
 0x148   : > { %v399_v45 = vpop.f32.mrf.mxu2  ;;  %v428_v46 = vpop.f32.mrf.mxu3 }
 0x150   : > { %v402_v47 = vpop.f32.mrf.mxu2  ;;  %v431_v48 = vpop.f32.mrf.mxu3 }
 0x158   : > { %v405_v49 = vpop.f32.mrf.mxu2  ;;  %v434_v50 = vpop.f32.mrf.mxu3 }
 0x159   : > { %475 = vmatpush.msrb.mxu1 %v405_v49  ;;  %495 = vmatpush.msrb.mxu2 %v434_v50  ;;  %v269_v49 = vld [vmem:[#allocation2 + $0x18] sm:$0xff]  ;;  %v270_v50 = vld [vmem:[#allocation2 + $0x48] sm:$0xff] }
 0x15b   : > { %476 = vmatpush.msrb.mxu1 %v402_v47  ;;  %496 = vmatpush.msrb.mxu2 %v431_v48 }
 0x15d   : > { %477 = vmatpush.msrb.mxu1 %v399_v45  ;;  %497 = vmatpush.msrb.mxu2 %v428_v46 }
 0x15f   : > { %478 = vmatpush.msrb.mxu1 %v396_v43  ;;  %498 = vmatpush.msrb.mxu2 %v425_v44 }
 0x160   : > { %922 = vmatmul.msk.f32.vlgmr.msrb.gmra.mxu1 %vm366_vm1, %v457_v38  ;;  %923 = vmatmul.msk.f32.vlgmr.msrb.gmra.mxu2 %vm366_vm1, %v457_v38 }
 0x1b2   : > { %v552_v2 = vpop.trf.xlu2 }
 0x1ba   : > { %v553_v7 = vpop.trf.xlu2 }
 0x1c2   : > { %v554_v9 = vpop.trf.xlu2 }
 0x1ca   : > { %v555_v10 = vpop.trf.xlu2 }
 0x1dd   : > { %v480_v51 = vpop.f32.mrf.mxu1 }
 0x1de   : > { %v503_v52 = vrot.slane %v480_v51, 4 }
 0x1e0   : > { %v504_v53 = vmax.f32 %v480_v51, %v503_v52  ;;  %v272_v52 = vld [vmem:[#allocation2 + $0xa8] sm:$0xff] }
 0x1e2   : > { %v505_v54 = vrot.slane %v504_v53, 2 }
 0x1e3   : > { %v500_v55 = vpop.f32.mrf.mxu2 }
 0x1e4   : > { %v506_v56 = vmax.f32 %v504_v53, %v505_v54  ;;  %v509_v57 = vrot.slane %v500_v55, 4 }
 0x1e6   : > { %v507_v58 = vrot.slane %v506_v56, 1  ;;  %v510_v59 = vmax.f32 %v500_v55, %v509_v57 }
 0x1e8   : > { %v508_v60 = vmax.f32 %v506_v56, %v507_v58  ;;  %v511_v61 = vrot.slane %v510_v59, 2 }
 0x1ea   : > { %v515_v62 = vsub.f32 %v480_v51, %v508_v60  ;;  %v512_v63 = vmax.f32 %v510_v59, %v511_v61  ;;  %v271_v51 = vld [vmem:[#allocation2 + $0x78] sm:$0xff] }
 0x1ec   : > { %v517_v0 = vmul.f32 1.442695, %v515_v62  ;;  %v513_v1 = vrot.slane %v512_v63, 1 }
 0x1ee   : > { %1007 = vpow2.f32 %v517_v0  ;;  %v514_v3 = vmax.f32 %v512_v63, %v513_v1 }
 0x1f0   : > { %v516_v4 = vsub.f32 %v500_v55, %v514_v3 }
 0x1f2   : > { %v519_v5 = vmul.f32 1.442695, %v516_v4 }
 0x1f4   : > { %v1008_v6 = vpop.eup %1007  ;;  %1009 = vpow2.f32 %v519_v5 }
 0x1f5   : > { %595 = vmatpush.msrb.mxu3 %v1008_v6  ;;  %v521_v11 = vrot.slane %v1008_v6, 4 }
 0x1f6   : > { %924 = vmatmul.msk.f32.vlgmr.msrb.gmra.mxu3 %vm295_vm0, %v552_v2 }
 0x1f7   : > { %v522_v13 = vadd.f32 %v1008_v6, %v521_v11 }
 0x1f9   : > { %v523_v17 = vrot.slane %v522_v13, 2 }
 0x1fa   : > { %v1010_v8 = vpop.eup %1009 }
 0x1fb   : > { %624 = vmatpush.msra.mxu0 %v1010_v8  ;;  %v527_v12 = vrot.slane %v1010_v8, 4  ;;  %v524_v19 = vadd.f32 %v523_v17, %v522_v13 }
 0x1fc   : > { %928 = vmatmul.msk.f32.vlgmr.msra.gmra.mxu0 %vm295_vm0, %v552_v2  ;;  %v273_v2 = vld [vmem:[#allocation2 + $0x20] sm:$0xf] }
 0x1fd   : > { %v528_v14 = vadd.f32 %v1010_v8, %v527_v12  ;;  %v525_v23 = vrot.slane %v524_v19, 1 }
 0x1fe   : > { %925 = vmatmul.msk.f32.gmra.mxu3 %vm295_vm0, %v553_v7 }
 0x1ff   : > { %v529_v18 = vrot.slane %v528_v14, 2  ;;  %v526_v25 = vadd.f32 %v525_v23, %v524_v19 }
 0x201   : > { %v530_v20 = vadd.f32 %v529_v18, %v528_v14  ;;  %1011 = vrcp.f32 %v526_v25 }
 0x203   : > { %v531_v24 = vrot.slane %v530_v20, 1 }
 0x204   : > { %929 = vmatmul.msk.f32.gmra.mxu0 %vm295_vm0, %v553_v7 }
 0x205   : > { %v532_v26 = vadd.f32 %v531_v24, %v530_v20 }
 0x206   : > { %926 = vmatmul.msk.f32.gmra.mxu3 %vm295_vm0, %v554_v9 }
 0x207   : > { %1013 = vrcp.f32 %v532_v26  ;;  %v1012_v37 = vpop.eup %1011 }
 0x20c   : > { %930 = vmatmul.msk.f32.gmra.mxu0 %vm295_vm0, %v554_v9 }
 0x20d   : > { %v1014_v38 = vpop.eup %1013 }
 0x20e   : > { %927 = vmatmul.msk.f32.gmra.mxu3 %vm295_vm0, %v555_v10 }
 0x214   : > { %931 = vmatmul.msk.f32.gmra.mxu0 %vm295_vm0, %v555_v10 }
 0x279   : > { %v597_v15 = vpop.f32.mrf.mxu3  ;;  %v626_v16 = vpop.f32.mrf.mxu0 }
 0x27a   : > { %v640_v47 = vmul.f32 %v1012_v37, %v597_v15  ;;  %v641_v48 = vmul.f32 %v1014_v38, %v626_v16 }
 0x281   : > { %v600_v21 = vpop.f32.mrf.mxu3  ;;  %v629_v22 = vpop.f32.mrf.mxu0 }
 0x282   : > { %v642_v45 = vmul.f32 %v1012_v37, %v600_v21  ;;  %v643_v46 = vmul.f32 %v1014_v38, %v629_v22 }
 0x289   : > { %v603_v29 = vpop.f32.mrf.mxu3  ;;  %v632_v32 = vpop.f32.mrf.mxu0 }
 0x28a   : > { %v644_v43 = vmul.f32 %v1012_v37, %v603_v29  ;;  %v645_v44 = vmul.f32 %v1014_v38, %v632_v32 }
 0x291   : > { %v606_v39 = vpop.f32.mrf.mxu3  ;;  %v635_v40 = vpop.f32.mrf.mxu0 }
 0x292   : > { %v646_v41 = vmul.f32 %v1012_v37, %v606_v39  ;;  %v647_v42 = vmul.f32 %v1014_v38, %v635_v40 }
 0x294   : > { %672 = vmatpush.msra.mxu1 %v646_v41  ;;  %701 = vmatpush.msra.mxu2 %v647_v42 }
 0x296   : > { %673 = vmatpush.msra.mxu1 %v644_v43  ;;  %702 = vmatpush.msra.mxu2 %v645_v44 }
 0x298   : > { %674 = vmatpush.msra.mxu1 %v642_v45  ;;  %703 = vmatpush.msra.mxu2 %v643_v46 }
 0x29a   : > { %675 = vmatpush.msra.mxu1 %v640_v47  ;;  %704 = vmatpush.msra.mxu2 %v641_v48 }
 0x29b   : > { %932 = vmatmul.msk.f32.vlgmr.msra.gmra.mxu1 %vm366_vm1, %v269_v49  ;;  %936 = vmatmul.msk.f32.vlgmr.msra.gmra.mxu2 %vm366_vm1, %v269_v49 }
 0x2a3   : > { %933 = vmatmul.msk.f32.gmra.mxu1 %vm366_vm1, %v270_v50  ;;  %937 = vmatmul.msk.f32.gmra.mxu2 %vm366_vm1, %v270_v50 }
 0x2ab   : > { %934 = vmatmul.msk.f32.gmra.mxu1 %vm366_vm1, %v271_v51  ;;  %938 = vmatmul.msk.f32.gmra.mxu2 %vm366_vm1, %v271_v51 }
 0x2b3   : > { %935 = vmatmul.msk.f32.gmra.mxu1 %vm366_vm1, %v272_v52  ;;  %939 = vmatmul.msk.f32.gmra.mxu2 %vm366_vm1, %v272_v52 }
 0x318   : > { %v677_v53 = vpop.f32.mrf.mxu1 }
 0x319   : > { %v718_v0 = vadd.f32 %v677_v53, %v1242_v35 }
 0x31e   : > { %v706_v54 = vpop.f32.mrf.mxu2 }
 0x320   : > { %v680_v55 = vpop.f32.mrf.mxu1 }
 0x321   : > { %v720_v62 = vadd.f32 %v680_v55, %v1236_v33 }
 0x326   : > { %v709_v56 = vpop.f32.mrf.mxu2 }
 0x328   : > { %v683_v57 = vpop.f32.mrf.mxu1 }
 0x329   : > { %v722_v61 = vadd.f32 %v683_v57, %v1230_v30  ;;  %v719_v30 = vadd.f32 %v706_v54, %v1244_v36 }
 0x32e   : > { %v712_v58 = vpop.f32.mrf.mxu2 }
 0x32f   : > { %v723_v3 = vadd.f32 %v712_v58, %v1232_v31 }
 0x330   : > { %v686_v59 = vpop.f32.mrf.mxu1 }
 0x331   : > { %v724_v60 = vadd.f32 %v686_v59, %v1226_v27  ;;  %v721_v27 = vadd.f32 %v709_v56, %v1238_v34 }
 0x333   : > { %746 = vmatpush.msra.mxu3 %v724_v60 }
 0x335   : > { %747 = vmatpush.msra.mxu3 %v722_v61 }
 0x336   : > { %v715_v63 = vpop.f32.mrf.mxu2 }
 0x337   : > { %v725_v1 = vadd.f32 %v715_v63, %v1228_v28  ;;  %748 = vmatpush.msra.mxu3 %v720_v62  ;;  %v729_v28 = vpop.permute.xlu0 %728 }
 0x339   : > { %749 = vmatpush.msra.mxu3 %v718_v0  ;;  %766 = vmatpush.msrb.mxu0 %v725_v1 }
 0x33a   : > { %940 = vmatmul.msk.f32.vlgmr.msra.gmra.mxu3 %vm366_vm1, %v273_v2 }
 0x33b   : > { %767 = vmatpush.msrb.mxu0 %v723_v3 }
 0x33d   : > { %768 = vmatpush.msrb.mxu0 %v721_v27 }
 0x33f   : > { %769 = vmatpush.msrb.mxu0 %v719_v30 }
 0x340   : > { %941 = vmatmul.msk.f32.vlgmr.msrb.gmra.mxu0 %vm366_vm1, %v273_v2 }
 0x3bd   : > { %v751_v31 = vpop.f32.mrf.mxu3  ;;  %v771_v33 = vpop.f32.mrf.mxu0 }
 0x3be   : > { %v772_v35 = vadd.f32 %v771_v33, %v729_v28  ;;  %v752_v34 = vadd.f32 %v751_v31, %v729_v28 }
 0x3c0   : > { %v776_v36 = vrot.slane %v772_v35, 4 }
 0x3c2   : > { %v778_v4 = vsel %vm777_vm2, %v752_v34, %v776_v36 }
 0x3c3   : > { %780 = vst [vmem:[%s235_s11] sm:$0xff] %v778_v4 }
 0x3c4   : > { %1072 = shalt.err (!%p1069_p8)
}
 0x3c5   : > { %954 = dma.vmem_to_hbm [thread:$0]  (%p1181_p5), %s796_s12, 128, %s798_s13, %s782_s19  }
 0x3c6 PF: > { %p966_p9 = scmp.ge.s32.totalorder %s1111_s18, 2  ;;  %s809_s30 = sand.u32 1, %s1099_s15  }
 0x3c7   : > { %s810_s5 = scalar_lea.sflag [#allocation4], %s809_s30 }
 0x3c8   : > { %p961_p10 = pnand %p966_p9, %p1185_p6 }
 0x3ca   : > { %p962_p11 = pneg %p961_p10 }
 0x3cc   : > { %1094 = dma.done.wait (%p962_p11), %s810_s5, 128  }
 0x3cd   : > { %1096 = vsyncadd (%p962_p11), %s810_s5, 4294967168  ;;  %p15_p12 = scmp.ge.s32.totalorder %s1168_s21, 4   ;;  %s1325_s15 = smov %s1103_s16 }
 0x3ce   : > { %s1326_s16 = smov %s1107_s17  ;;  %s1327_s17 = smov %s1179_s24 }
 0x3cf   : > { %s1328_s18 = smov %s1168_s21  ;;  %17 = sbr.rel (!%p15_p12) target bundleno = 4 (0x4), region = 82 }
 0x3d4   :  { %816 = vsyncpa [#allocation3], 1 }
 0x3d5   :  { %818 = vsyncpa [#allocation3 + $0x1], 1 }
 0x3d6   :  { %819 = vsyncpa [#allocation4], 1 }
 0x3d7   :  { %821 = vsyncpa [#allocation4 + $0x1], 1 }

</bundles_post_ra>
